<compile_context>
chip_gen: v7x
topology: tpu7x:2x2x1
jax: 0.10.0
libtpu: 0.0.40
codegen_flags: <defaults>
</compile_context>

<pallas_src>
import functools

import jax
import jax.numpy as jnp
import numpy as np
from jax import lax
from jax.experimental import pallas as pl
from jax.experimental.pallas import tpu as pltpu


def _controller_kernel(
    xproj_ref,    # (T, B, 4H)   precomputed x @ W_ih^T + (b_ih + b_hh), time-major
    bypass_ref,   # (B, n_bypass*P)  feature-grouped bypass (col j*P+p = bypass[:,p,j])
    w_hh_t_ref,   # (H, 4H)      pre-transposed recurrent weights
    fc_w_t_ref,   # (H, D_out*P) pre-transposed + feature-grouped FC weights
    fc_b_ref,     # (1, D_out*P) feature-grouped FC bias
    pred_ref,     # out: (B, D_out*P)  feature-grouped (normalised) predictions
    feats_ref,    # out: (B, n_avail*P) denormalised [pv | load | price]
    *,
    hidden_dim,
    prediction_horizon,
    available_features,
    output_features,
    bypass_features,
    sc_min,
    sc_max,
):
    T, B, _ = xproj_ref.shape
    H = hidden_dim
    P = prediction_horizon

    w_hh_t = w_hh_t_ref[...]                       # (H, 4H), already transposed

    # Lane mask selecting the "g" (cell-candidate) gate region [2H, 3H) of the
    # fused i|f|g|o gate vector; precomputed once, reused every step.
    lane = lax.broadcasted_iota(jnp.int32, (B, 4 * H), 1)
    g_mask = (lane >= 2 * H) & (lane < 3 * H)

    # ----- LSTM recurrence (PyTorch gate order: i, f, g, o) -----
    def step(t, carry):
        h, c = carry
        gates = xproj_ref[t] + jnp.dot(
            h, w_hh_t, preferred_element_type=jnp.float32
        )                                          # (B, 4H)
        # Full-vreg activations on the EUP + one VPU select; slice the already
        # activated result once (no slice-then-activate lane shuffles per gate).
        act = jnp.where(g_mask, jnp.tanh(gates), jax.nn.sigmoid(gates))
        i_g = act[:, 0 * H:1 * H]
        f_g = act[:, 1 * H:2 * H]
        g_g = act[:, 2 * H:3 * H]
        o_g = act[:, 3 * H:4 * H]
        c_new = f_g * c + i_g * g_g
        h_new = o_g * jnp.tanh(c_new)
        return h_new, c_new

    h0 = jnp.zeros((B, H), jnp.float32)
    c0 = jnp.zeros((B, H), jnp.float32)
    h_last, _ = lax.fori_loop(0, T, step, (h0, c0), unroll=True)   # (B, H)

    # ----- fully-connected head (weights already transposed + grouped) -----
    fc_out = (
        jnp.dot(h_last, fc_w_t_ref[...], preferred_element_type=jnp.float32)
        + fc_b_ref[...]
    )                                              # (B, D_out*P), col d*P+p = pred[b,p,d]
    pred_ref[...] = fc_out

    # ----- static feature routing + denormalisation (contiguous lane slices) -----
    byp = bypass_ref[...]                          # (B, n_bypass*P)
    for i, feat in enumerate(available_features):
        if feat in output_features:
            d = output_features.index(feat)
            v = fc_out[:, d * P:(d + 1) * P]
        else:
            j = bypass_features.index(feat)
            v = byp[:, j * P:(j + 1) * P]
        # denormalise: x * (max - min) + min
        feats_ref[:, i * P:(i + 1) * P] = v * (sc_max[i] - sc_min[i]) + sc_min[i]


def controller_forward(
    inputs,          # (B, T, D_in), batch_first like torch nn.LSTM(batch_first=True)
    bypass,          # (B, P, n_bypass)
    initial_state,   # (B, 1) -- only consumed by the (untranslated) cvxpy layer
    params,
    *,
    hidden_dim,
    prediction_horizon,
    output_dim,
    available_features,
    output_features,
    bypass_features,
    sc_min,
    sc_max,
):
    del initial_state  # only used by the cvxpy optimisation layer (see TODO above)

    B, T, D_in = inputs.shape
    H = hidden_dim
    P = prediction_horizon
    n_avail = len(available_features)
    n_bypass = len(bypass_features)

    x = inputs.astype(jnp.float32)
    w_ih = params["w_ih"].astype(jnp.float32)                      # (4H, D_in)
    w_hh = params["w_hh"].astype(jnp.float32)                      # (4H, H)
    b = (params["b_ih"] + params["b_hh"]).astype(jnp.float32)      # (4H,)
    fc_w = params["fc_w"].astype(jnp.float32)                      # (P*D_out, H)
    fc_b = params["fc_b"].astype(jnp.float32)                      # (P*D_out,)

    # Hoist the input projection out of the serial recurrence (time-major layout).
    x_proj = jnp.einsum("btd,gd->tbg", x, w_ih) + b[None, None, :]  # (T, B, 4H)

    # Pre-transpose the recurrent weights once, outside the kernel.
    w_hh_t = w_hh.T                                                 # (H, 4H)

    # Permute FC rows so the FC output is grouped by feature:
    #   original column p*D_out + d  ->  grouped column d*P + p.
    perm = np.array(
        [p * output_dim + d for d in range(output_dim) for p in range(P)],
        dtype=np.int32,
    )
    fc_w_t_g = fc_w[perm, :].T                                      # (H, D_out*P)
    fc_b_g = fc_b[perm].reshape(1, -1)                              # (1, D_out*P)

    # Group bypass features along lanes: column j*P + p = bypass[:, p, j].
    bypass_g = jnp.transpose(bypass.astype(jnp.float32), (0, 2, 1)).reshape(
        B, n_bypass * P
    )

    kernel = functools.partial(
        _controller_kernel,
        hidden_dim=H,
        prediction_horizon=P,
        available_features=tuple(available_features),
        output_features=tuple(output_features),
        bypass_features=tuple(bypass_features),
        sc_min=tuple(float(v) for v in sc_min),
        sc_max=tuple(float(v) for v in sc_max),
    )

    vmem_spec = pl.BlockSpec(memory_space=pltpu.MemorySpace.VMEM)

    out_shapes = (
        jax.ShapeDtypeStruct((B, output_dim * P), jnp.float32),   # grouped predictions
        jax.ShapeDtypeStruct((B, n_avail * P), jnp.float32),      # [pv | load | price]
    )

    pred_g, feats = pl.pallas_call(
        kernel,
        out_shape=out_shapes,
        in_specs=[vmem_spec] * 5,
        out_specs=(vmem_spec, vmem_spec),
    )(x_proj, bypass_g, w_hh_t, fc_w_t_g, fc_b_g)

    # Un-group in the wrapper (cheap XLA reshapes on tiny tensors).
    predictions = pred_g.reshape(B, output_dim, P).transpose(0, 2, 1)  # (B, P, D_out)
    # available_features order is fixed to [pv, load, price] by the module.
    pv_hat = feats[:, 0 * P:1 * P]
    load_hat = feats[:, 1 * P:2 * P]
    price_hat = feats[:, 2 * P:3 * P]
    return predictions, price_hat, load_hat, pv_hat


def _reference_forward(
    inputs, bypass, params, *, hidden_dim, prediction_horizon, output_dim,
    available_features, output_features, bypass_features, sc_min, sc_max,
):
    """Pure-JAX reference matching torch.nn.LSTM(batch_first=True) + Linear."""
    B, T, _ = inputs.shape
    H = hidden_dim
    w_ih, w_hh = params["w_ih"], params["w_hh"]
    b = params["b_ih"] + params["b_hh"]
    h = jnp.zeros((B, H), jnp.float32)
    c = jnp.zeros((B, H), jnp.float32)
    for t in range(T):
        gates = inputs[:, t, :] @ w_ih.T + h @ w_hh.T + b
        i_g = jax.nn.sigmoid(gates[:, 0 * H:1 * H])
        f_g = jax.nn.sigmoid(gates[:, 1 * H:2 * H])
        g_g = jnp.tanh(gates[:, 2 * H:3 * H])
        o_g = jax.nn.sigmoid(gates[:, 3 * H:4 * H])
        c = f_g * c + i_g * g_g
        h = o_g * jnp.tanh(c)
    fc_out = h @ params["fc_w"].T + params["fc_b"]
    preds = fc_out.reshape(B, prediction_horizon, output_dim)
    feats = []
    for i, feat in enumerate(available_features):
        if feat in output_features:
            v = preds[:, :, output_features.index(feat)]
        else:
            v = bypass[:, :, bypass_features.index(feat)]
        feats.append(v * (sc_max[i] - sc_min[i]) + sc_min[i])
    return preds, feats[2], feats[1], feats[0]   # predictions, price, load, pv


if __name__ == "__main__":
    # ---- synthetic "dataset" configuration ----
    B = 2                       # batch
    T = 8                       # lookback_window
    D_in = 4                    # len(input_features)
    H = 32                      # hidden_dim
    P = 8                       # prediction_horizon
    available_features = ["pv", "load", "price"]   # order fixed by _select_parameters_and_denormalise
    output_features = ["price", "load"]            # predicted by the NN
    bypass_features = ["pv"]                       # known / bypassed
    D_out = len(output_features)
    sc_min = (0.0, 0.0, 10.0)   # per available feature
    sc_max = (5.0, 12.0, 90.0)

    key = jax.random.PRNGKey(0)
    keys = jax.random.split(key, 10)

    # Deterministic param init, PyTorch-style uniform(-1/sqrt(H), 1/sqrt(H)).
    k = 1.0 / jnp.sqrt(jnp.float32(H))
    params = {
        "w_ih": jax.random.uniform(keys[0], (4 * H, D_in), jnp.float32, -k, k),
        "w_hh": jax.random.uniform(keys[1], (4 * H, H), jnp.float32, -k, k),
        "b_ih": jax.random.uniform(keys[2], (4 * H,), jnp.float32, -k, k),
        "b_hh": jax.random.uniform(keys[3], (4 * H,), jnp.float32, -k, k),
        "fc_w": jax.random.uniform(keys[4], (P * D_out, H), jnp.float32, -k, k),
        "fc_b": jax.random.uniform(keys[5], (P * D_out,), jnp.float32, -k, k),
    }

    inputs = jax.random.normal(keys[6], (B, T, D_in), jnp.float32)
    bypass = jax.random.uniform(keys[7], (B, P, len(bypass_features)), jnp.float32)
    initial_state = jnp.zeros((B, 1), jnp.float32)

    predictions, price_hat, load_hat, pv_hat = controller_forward(
        inputs,
        bypass,
        initial_state,
        params,
        hidden_dim=H,
        prediction_horizon=P,
        output_dim=D_out,
        available_features=available_features,
        output_features=output_features,
        bypass_features=bypass_features,
        sc_min=sc_min,
        sc_max=sc_max,
    )
    jax.block_until_ready((predictions, price_hat, load_hat, pv_hat))

    assert predictions.shape == (B, P, D_out)
    assert price_hat.shape == (B, P)
    assert load_hat.shape == (B, P)
    assert pv_hat.shape == (B, P)

    # Correctness check against a pure-JAX reference of the PyTorch forward.
    ref_pred, ref_price, ref_load, ref_pv = _reference_forward(
        inputs, bypass, params,
        hidden_dim=H, prediction_horizon=P, output_dim=D_out,
        available_features=available_features, output_features=output_features,
        bypass_features=bypass_features, sc_min=sc_min, sc_max=sc_max,
    )
    np.testing.assert_allclose(np.asarray(predictions), np.asarray(ref_pred), rtol=1e-3, atol=5e-3)
    np.testing.assert_allclose(np.asarray(price_hat), np.asarray(ref_price), rtol=1e-3, atol=5e-3)
    np.testing.assert_allclose(np.asarray(load_hat), np.asarray(ref_load), rtol=1e-3, atol=5e-3)
    np.testing.assert_allclose(np.asarray(pv_hat), np.asarray(ref_pv), rtol=1e-3, atol=5e-3)

    print("KERNEL_OK")
</pallas_src>

<mosaic_0001>
module attributes {stable_mosaic.version = 11 : i64} {
  func.func @_controller_kernel(%arg0: memref<8x2x128xf32, #tpu.memory_space<vmem>>, %arg1: memref<2x8xf32, #tpu.memory_space<vmem>>, %arg2: memref<32x128xf32, #tpu.memory_space<vmem>>, %arg3: memref<32x16xf32, #tpu.memory_space<vmem>>, %arg4: memref<1x16xf32, #tpu.memory_space<vmem>>, %arg5: memref<2x16xf32, #tpu.memory_space<vmem>>, %arg6: memref<2x24xf32, #tpu.memory_space<vmem>>) attributes {dimension_semantics = [], scalar_prefetch = 0 : i64, scratch_operands = 0 : i64, tpu.core_type = #tpu.core_type<tc>} {
    %c0 = arith.constant 0 : index
    %c0_0 = arith.constant 0 : index
    %0 = vector.load %arg2[%c0, %c0_0] : memref<32x128xf32, #tpu.memory_space<vmem>>, vector<32x128xf32>
    %1 = tpu.iota {dimensions = array<i32: 1>} : vector<2x128xi32>
    %c64_i32 = arith.constant 64 : i32
    %2 = vector.broadcast %c64_i32 : i32 to vector<2x128xi32>
    %3 = arith.cmpi sge, %1, %2 : vector<2x128xi32>
    %c96_i32 = arith.constant 96 : i32
    %4 = vector.broadcast %c96_i32 : i32 to vector<2x128xi32>
    %5 = arith.cmpi slt, %1, %4 : vector<2x128xi32>
    %6 = arith.andi %3, %5 : vector<2x128xi1>
    %cst = arith.constant 0.000000e+00 : f32
    %7 = vector.broadcast %cst : f32 to vector<2x32xf32>
    %cst_1 = arith.constant 0.000000e+00 : f32
    %8 = vector.broadcast %cst_1 : f32 to vector<2x32xf32>
    %c0_i32 = arith.constant 0 : i32
    %9 = arith.index_cast %c0_i32 : i32 to index
    %c0_2 = arith.constant 0 : index
    %c0_3 = arith.constant 0 : index
    %10 = vector.load %arg0[%9, %c0_2, %c0_3] : memref<8x2x128xf32, #tpu.memory_space<vmem>>, vector<1x2x128xf32>
    %11 = vector.shape_cast %10 : vector<1x2x128xf32> to vector<2x128xf32>
    %cst_4 = arith.constant dense<0.000000e+00> : vector<2x128xf32>
    %12 = tpu.matmul %7, %0, %cst_4 {dimension_numbers = #tpu.dot_dimension_numbers<[1], [0], [0], [1], [0, 0, 1, 1], [], []>} : vector<2x32xf32>, vector<32x128xf32>, vector<2x128xf32> -> vector<2x128xf32>
    %13 = arith.addf %11, %12 : vector<2x128xf32>
    %14 = math.tanh %13 : vector<2x128xf32>
    %15 = arith.negf %13 : vector<2x128xf32>
    %16 = math.exp %15 : vector<2x128xf32>
    %cst_5 = arith.constant 1.000000e+00 : f32
    %17 = vector.broadcast %cst_5 : f32 to vector<2x128xf32>
    %18 = arith.addf %17, %16 : vector<2x128xf32>
    %19 = arith.divf %17, %18 : vector<2x128xf32>
    %20 = arith.select %6, %14, %19 : vector<2x128xi1>, vector<2x128xf32>
    %21 = vector.extract_strided_slice %20 {offsets = [0, 0], sizes = [2, 32], strides = [1, 1]} : vector<2x128xf32> to vector<2x32xf32>
    %22 = vector.extract_strided_slice %20 {offsets = [0, 32], sizes = [2, 32], strides = [1, 1]} : vector<2x128xf32> to vector<2x32xf32>
    %23 = vector.extract_strided_slice %20 {offsets = [0, 64], sizes = [2, 32], strides = [1, 1]} : vector<2x128xf32> to vector<2x32xf32>
    %24 = vector.extract_strided_slice %20 {offsets = [0, 96], sizes = [2, 32], strides = [1, 1]} : vector<2x128xf32> to vector<2x32xf32>
    %25 = arith.mulf %22, %8 : vector<2x32xf32>
    %26 = arith.mulf %21, %23 : vector<2x32xf32>
    %27 = arith.addf %25, %26 : vector<2x32xf32>
    %28 = math.tanh %27 : vector<2x32xf32>
    %29 = arith.mulf %24, %28 : vector<2x32xf32>
    %c1_i32 = arith.constant 1 : i32
    %30 = arith.index_cast %c1_i32 : i32 to index
    %c0_6 = arith.constant 0 : index
    %c0_7 = arith.constant 0 : index
    %31 = vector.load %arg0[%30, %c0_6, %c0_7] : memref<8x2x128xf32, #tpu.memory_space<vmem>>, vector<1x2x128xf32>
    %32 = vector.shape_cast %31 : vector<1x2x128xf32> to vector<2x128xf32>
    %cst_8 = arith.constant dense<0.000000e+00> : vector<2x128xf32>
    %33 = tpu.matmul %29, %0, %cst_8 {dimension_numbers = #tpu.dot_dimension_numbers<[1], [0], [0], [1], [0, 0, 1, 1], [], []>} : vector<2x32xf32>, vector<32x128xf32>, vector<2x128xf32> -> vector<2x128xf32>
    %34 = arith.addf %32, %33 : vector<2x128xf32>
    %35 = math.tanh %34 : vector<2x128xf32>
    %36 = arith.negf %34 : vector<2x128xf32>
    %37 = math.exp %36 : vector<2x128xf32>
    %cst_9 = arith.constant 1.000000e+00 : f32
    %38 = vector.broadcast %cst_9 : f32 to vector<2x128xf32>
    %39 = arith.addf %38, %37 : vector<2x128xf32>
    %40 = arith.divf %38, %39 : vector<2x128xf32>
    %41 = arith.select %6, %35, %40 : vector<2x128xi1>, vector<2x128xf32>
    %42 = vector.extract_strided_slice %41 {offsets = [0, 0], sizes = [2, 32], strides = [1, 1]} : vector<2x128xf32> to vector<2x32xf32>
    %43 = vector.extract_strided_slice %41 {offsets = [0, 32], sizes = [2, 32], strides = [1, 1]} : vector<2x128xf32> to vector<2x32xf32>
    %44 = vector.extract_strided_slice %41 {offsets = [0, 64], sizes = [2, 32], strides = [1, 1]} : vector<2x128xf32> to vector<2x32xf32>
    %45 = vector.extract_strided_slice %41 {offsets = [0, 96], sizes = [2, 32], strides = [1, 1]} : vector<2x128xf32> to vector<2x32xf32>
    %46 = arith.mulf %43, %27 : vector<2x32xf32>
    %47 = arith.mulf %42, %44 : vector<2x32xf32>
    %48 = arith.addf %46, %47 : vector<2x32xf32>
    %49 = math.tanh %48 : vector<2x32xf32>
    %50 = arith.mulf %45, %49 : vector<2x32xf32>
    %c2_i32 = arith.constant 2 : i32
    %51 = arith.index_cast %c2_i32 : i32 to index
    %c0_10 = arith.constant 0 : index
    %c0_11 = arith.constant 0 : index
    %52 = vector.load %arg0[%51, %c0_10, %c0_11] : memref<8x2x128xf32, #tpu.memory_space<vmem>>, vector<1x2x128xf32>
    %53 = vector.shape_cast %52 : vector<1x2x128xf32> to vector<2x128xf32>
    %cst_12 = arith.constant dense<0.000000e+00> : vector<2x128xf32>
    %54 = tpu.matmul %50, %0, %cst_12 {dimension_numbers = #tpu.dot_dimension_numbers<[1], [0], [0], [1], [0, 0, 1, 1], [], []>} : vector<2x32xf32>, vector<32x128xf32>, vector<2x128xf32> -> vector<2x128xf32>
    %55 = arith.addf %53, %54 : vector<2x128xf32>
    %56 = math.tanh %55 : vector<2x128xf32>
    %57 = arith.negf %55 : vector<2x128xf32>
    %58 = math.exp %57 : vector<2x128xf32>
    %cst_13 = arith.constant 1.000000e+00 : f32
    %59 = vector.broadcast %cst_13 : f32 to vector<2x128xf32>
    %60 = arith.addf %59, %58 : vector<2x128xf32>
    %61 = arith.divf %59, %60 : vector<2x128xf32>
    %62 = arith.select %6, %56, %61 : vector<2x128xi1>, vector<2x128xf32>
    %63 = vector.extract_strided_slice %62 {offsets = [0, 0], sizes = [2, 32], strides = [1, 1]} : vector<2x128xf32> to vector<2x32xf32>
    %64 = vector.extract_strided_slice %62 {offsets = [0, 32], sizes = [2, 32], strides = [1, 1]} : vector<2x128xf32> to vector<2x32xf32>
    %65 = vector.extract_strided_slice %62 {offsets = [0, 64], sizes = [2, 32], strides = [1, 1]} : vector<2x128xf32> to vector<2x32xf32>
    %66 = vector.extract_strided_slice %62 {offsets = [0, 96], sizes = [2, 32], strides = [1, 1]} : vector<2x128xf32> to vector<2x32xf32>
    %67 = arith.mulf %64, %48 : vector<2x32xf32>
    %68 = arith.mulf %63, %65 : vector<2x32xf32>
    %69 = arith.addf %67, %68 : vector<2x32xf32>
    %70 = math.tanh %69 : vector<2x32xf32>
    %71 = arith.mulf %66, %70 : vector<2x32xf32>
    %c3_i32 = arith.constant 3 : i32
    %72 = arith.index_cast %c3_i32 : i32 to index
    %c0_14 = arith.constant 0 : index
    %c0_15 = arith.constant 0 : index
    %73 = vector.load %arg0[%72, %c0_14, %c0_15] : memref<8x2x128xf32, #tpu.memory_space<vmem>>, vector<1x2x128xf32>
    %74 = vector.shape_cast %73 : vector<1x2x128xf32> to vector<2x128xf32>
    %cst_16 = arith.constant dense<0.000000e+00> : vector<2x128xf32>
    %75 = tpu.matmul %71, %0, %cst_16 {dimension_numbers = #tpu.dot_dimension_numbers<[1], [0], [0], [1], [0, 0, 1, 1], [], []>} : vector<2x32xf32>, vector<32x128xf32>, vector<2x128xf32> -> vector<2x128xf32>
    %76 = arith.addf %74, %75 : vector<2x128xf32>
    %77 = math.tanh %76 : vector<2x128xf32>
    %78 = arith.negf %76 : vector<2x128xf32>
    %79 = math.exp %78 : vector<2x128xf32>
    %cst_17 = arith.constant 1.000000e+00 : f32
    %80 = vector.broadcast %cst_17 : f32 to vector<2x128xf32>
    %81 = arith.addf %80, %79 : vector<2x128xf32>
    %82 = arith.divf %80, %81 : vector<2x128xf32>
    %83 = arith.select %6, %77, %82 : vector<2x128xi1>, vector<2x128xf32>
    %84 = vector.extract_strided_slice %83 {offsets = [0, 0], sizes = [2, 32], strides = [1, 1]} : vector<2x128xf32> to vector<2x32xf32>
    %85 = vector.extract_strided_slice %83 {offsets = [0, 32], sizes = [2, 32], strides = [1, 1]} : vector<2x128xf32> to vector<2x32xf32>
    %86 = vector.extract_strided_slice %83 {offsets = [0, 64], sizes = [2, 32], strides = [1, 1]} : vector<2x128xf32> to vector<2x32xf32>
    %87 = vector.extract_strided_slice %83 {offsets = [0, 96], sizes = [2, 32], strides = [1, 1]} : vector<2x128xf32> to vector<2x32xf32>
    %88 = arith.mulf %85, %69 : vector<2x32xf32>
    %89 = arith.mulf %84, %86 : vector<2x32xf32>
    %90 = arith.addf %88, %89 : vector<2x32xf32>
    %91 = math.tanh %90 : vector<2x32xf32>
    %92 = arith.mulf %87, %91 : vector<2x32xf32>
    %c4_i32 = arith.constant 4 : i32
    %93 = arith.index_cast %c4_i32 : i32 to index
    %c0_18 = arith.constant 0 : index
    %c0_19 = arith.constant 0 : index
    %94 = vector.load %arg0[%93, %c0_18, %c0_19] : memref<8x2x128xf32, #tpu.memory_space<vmem>>, vector<1x2x128xf32>
    %95 = vector.shape_cast %94 : vector<1x2x128xf32> to vector<2x128xf32>
    %cst_20 = arith.constant dense<0.000000e+00> : vector<2x128xf32>
    %96 = tpu.matmul %92, %0, %cst_20 {dimension_numbers = #tpu.dot_dimension_numbers<[1], [0], [0], [1], [0, 0, 1, 1], [], []>} : vector<2x32xf32>, vector<32x128xf32>, vector<2x128xf32> -> vector<2x128xf32>
    %97 = arith.addf %95, %96 : vector<2x128xf32>
    %98 = math.tanh %97 : vector<2x128xf32>
    %99 = arith.negf %97 : vector<2x128xf32>
    %100 = math.exp %99 : vector<2x128xf32>
    %cst_21 = arith.constant 1.000000e+00 : f32
    %101 = vector.broadcast %cst_21 : f32 to vector<2x128xf32>
    %102 = arith.addf %101, %100 : vector<2x128xf32>
    %103 = arith.divf %101, %102 : vector<2x128xf32>
    %104 = arith.select %6, %98, %103 : vector<2x128xi1>, vector<2x128xf32>
    %105 = vector.extract_strided_slice %104 {offsets = [0, 0], sizes = [2, 32], strides = [1, 1]} : vector<2x128xf32> to vector<2x32xf32>
    %106 = vector.extract_strided_slice %104 {offsets = [0, 32], sizes = [2, 32], strides = [1, 1]} : vector<2x128xf32> to vector<2x32xf32>
    %107 = vector.extract_strided_slice %104 {offsets = [0, 64], sizes = [2, 32], strides = [1, 1]} : vector<2x128xf32> to vector<2x32xf32>
    %108 = vector.extract_strided_slice %104 {offsets = [0, 96], sizes = [2, 32], strides = [1, 1]} : vector<2x128xf32> to vector<2x32xf32>
    %109 = arith.mulf %106, %90 : vector<2x32xf32>
    %110 = arith.mulf %105, %107 : vector<2x32xf32>
    %111 = arith.addf %109, %110 : vector<2x32xf32>
    %112 = math.tanh %111 : vector<2x32xf32>
    %113 = arith.mulf %108, %112 : vector<2x32xf32>
    %c5_i32 = arith.constant 5 : i32
    %114 = arith.index_cast %c5_i32 : i32 to index
    %c0_22 = arith.constant 0 : index
    %c0_23 = arith.constant 0 : index
    %115 = vector.load %arg0[%114, %c0_22, %c0_23] : memref<8x2x128xf32, #tpu.memory_space<vmem>>, vector<1x2x128xf32>
    %116 = vector.shape_cast %115 : vector<1x2x128xf32> to vector<2x128xf32>
    %cst_24 = arith.constant dense<0.000000e+00> : vector<2x128xf32>
    %117 = tpu.matmul %113, %0, %cst_24 {dimension_numbers = #tpu.dot_dimension_numbers<[1], [0], [0], [1], [0, 0, 1, 1], [], []>} : vector<2x32xf32>, vector<32x128xf32>, vector<2x128xf32> -> vector<2x128xf32>
    %118 = arith.addf %116, %117 : vector<2x128xf32>
    %119 = math.tanh %118 : vector<2x128xf32>
    %120 = arith.negf %118 : vector<2x128xf32>
    %121 = math.exp %120 : vector<2x128xf32>
    %cst_25 = arith.constant 1.000000e+00 : f32
    %122 = vector.broadcast %cst_25 : f32 to vector<2x128xf32>
    %123 = arith.addf %122, %121 : vector<2x128xf32>
    %124 = arith.divf %122, %123 : vector<2x128xf32>
    %125 = arith.select %6, %119, %124 : vector<2x128xi1>, vector<2x128xf32>
    %126 = vector.extract_strided_slice %125 {offsets = [0, 0], sizes = [2, 32], strides = [1, 1]} : vector<2x128xf32> to vector<2x32xf32>
    %127 = vector.extract_strided_slice %125 {offsets = [0, 32], sizes = [2, 32], strides = [1, 1]} : vector<2x128xf32> to vector<2x32xf32>
    %128 = vector.extract_strided_slice %125 {offsets = [0, 64], sizes = [2, 32], strides = [1, 1]} : vector<2x128xf32> to vector<2x32xf32>
    %129 = vector.extract_strided_slice %125 {offsets = [0, 96], sizes = [2, 32], strides = [1, 1]} : vector<2x128xf32> to vector<2x32xf32>
    %130 = arith.mulf %127, %111 : vector<2x32xf32>
    %131 = arith.mulf %126, %128 : vector<2x32xf32>
    %132 = arith.addf %130, %131 : vector<2x32xf32>
    %133 = math.tanh %132 : vector<2x32xf32>
    %134 = arith.mulf %129, %133 : vector<2x32xf32>
    %c6_i32 = arith.constant 6 : i32
    %135 = arith.index_cast %c6_i32 : i32 to index
    %c0_26 = arith.constant 0 : index
    %c0_27 = arith.constant 0 : index
    %136 = vector.load %arg0[%135, %c0_26, %c0_27] : memref<8x2x128xf32, #tpu.memory_space<vmem>>, vector<1x2x128xf32>
    %137 = vector.shape_cast %136 : vector<1x2x128xf32> to vector<2x128xf32>
    %cst_28 = arith.constant dense<0.000000e+00> : vector<2x128xf32>
    %138 = tpu.matmul %134, %0, %cst_28 {dimension_numbers = #tpu.dot_dimension_numbers<[1], [0], [0], [1], [0, 0, 1, 1], [], []>} : vector<2x32xf32>, vector<32x128xf32>, vector<2x128xf32> -> vector<2x128xf32>
    %139 = arith.addf %137, %138 : vector<2x128xf32>
    %140 = math.tanh %139 : vector<2x128xf32>
    %141 = arith.negf %139 : vector<2x128xf32>
    %142 = math.exp %141 : vector<2x128xf32>
    %cst_29 = arith.constant 1.000000e+00 : f32
    %143 = vector.broadcast %cst_29 : f32 to vector<2x128xf32>
    %144 = arith.addf %143, %142 : vector<2x128xf32>
    %145 = arith.divf %143, %144 : vector<2x128xf32>
    %146 = arith.select %6, %140, %145 : vector<2x128xi1>, vector<2x128xf32>
    %147 = vector.extract_strided_slice %146 {offsets = [0, 0], sizes = [2, 32], strides = [1, 1]} : vector<2x128xf32> to vector<2x32xf32>
    %148 = vector.extract_strided_slice %146 {offsets = [0, 32], sizes = [2, 32], strides = [1, 1]} : vector<2x128xf32> to vector<2x32xf32>
    %149 = vector.extract_strided_slice %146 {offsets = [0, 64], sizes = [2, 32], strides = [1, 1]} : vector<2x128xf32> to vector<2x32xf32>
    %150 = vector.extract_strided_slice %146 {offsets = [0, 96], sizes = [2, 32], strides = [1, 1]} : vector<2x128xf32> to vector<2x32xf32>
    %151 = arith.mulf %148, %132 : vector<2x32xf32>
    %152 = arith.mulf %147, %149 : vector<2x32xf32>
    %153 = arith.addf %151, %152 : vector<2x32xf32>
    %154 = math.tanh %153 : vector<2x32xf32>
    %155 = arith.mulf %150, %154 : vector<2x32xf32>
    %c7_i32 = arith.constant 7 : i32
    %156 = arith.index_cast %c7_i32 : i32 to index
    %c0_30 = arith.constant 0 : index
    %c0_31 = arith.constant 0 : index
    %157 = vector.load %arg0[%156, %c0_30, %c0_31] : memref<8x2x128xf32, #tpu.memory_space<vmem>>, vector<1x2x128xf32>
    %158 = vector.shape_cast %157 : vector<1x2x128xf32> to vector<2x128xf32>
    %cst_32 = arith.constant dense<0.000000e+00> : vector<2x128xf32>
    %159 = tpu.matmul %155, %0, %cst_32 {dimension_numbers = #tpu.dot_dimension_numbers<[1], [0], [0], [1], [0, 0, 1, 1], [], []>} : vector<2x32xf32>, vector<32x128xf32>, vector<2x128xf32> -> vector<2x128xf32>
    %160 = arith.addf %158, %159 : vector<2x128xf32>
    %161 = math.tanh %160 : vector<2x128xf32>
    %162 = arith.negf %160 : vector<2x128xf32>
    %163 = math.exp %162 : vector<2x128xf32>
    %cst_33 = arith.constant 1.000000e+00 : f32
    %164 = vector.broadcast %cst_33 : f32 to vector<2x128xf32>
    %165 = arith.addf %164, %163 : vector<2x128xf32>
    %166 = arith.divf %164, %165 : vector<2x128xf32>
    %167 = arith.select %6, %161, %166 : vector<2x128xi1>, vector<2x128xf32>
    %168 = vector.extract_strided_slice %167 {offsets = [0, 0], sizes = [2, 32], strides = [1, 1]} : vector<2x128xf32> to vector<2x32xf32>
    %169 = vector.extract_strided_slice %167 {offsets = [0, 32], sizes = [2, 32], strides = [1, 1]} : vector<2x128xf32> to vector<2x32xf32>
    %170 = vector.extract_strided_slice %167 {offsets = [0, 64], sizes = [2, 32], strides = [1, 1]} : vector<2x128xf32> to vector<2x32xf32>
    %171 = vector.extract_strided_slice %167 {offsets = [0, 96], sizes = [2, 32], strides = [1, 1]} : vector<2x128xf32> to vector<2x32xf32>
    %172 = arith.mulf %169, %153 : vector<2x32xf32>
    %173 = arith.mulf %168, %170 : vector<2x32xf32>
    %174 = arith.addf %172, %173 : vector<2x32xf32>
    %175 = math.tanh %174 : vector<2x32xf32>
    %176 = arith.mulf %171, %175 : vector<2x32xf32>
    %c8_i32 = arith.constant 8 : i32
    %c0_34 = arith.constant 0 : index
    %c0_35 = arith.constant 0 : index
    %177 = vector.load %arg3[%c0_34, %c0_35] : memref<32x16xf32, #tpu.memory_space<vmem>>, vector<32x16xf32>
    %cst_36 = arith.constant dense<0.000000e+00> : vector<2x16xf32>
    %178 = tpu.matmul %176, %177, %cst_36 {dimension_numbers = #tpu.dot_dimension_numbers<[1], [0], [0], [1], [0, 0, 1, 1], [], []>} : vector<2x32xf32>, vector<32x16xf32>, vector<2x16xf32> -> vector<2x16xf32>
    %c0_37 = arith.constant 0 : index
    %c0_38 = arith.constant 0 : index
    %179 = vector.load %arg4[%c0_37, %c0_38] : memref<1x16xf32, #tpu.memory_space<vmem>>, vector<1x16xf32>
    %180 = vector.broadcast %179 : vector<1x16xf32> to vector<2x16xf32>
    %181 = arith.addf %178, %180 : vector<2x16xf32>
    %c0_39 = arith.constant 0 : index
    %c0_40 = arith.constant 0 : index
    %182 = vector.load %arg5[%c0_39, %c0_40] : memref<2x16xf32, #tpu.memory_space<vmem>>, vector<2x16xf32>
    tpu.vector_store %arg5[%c0_39, %c0_40], %181 {strides = array<i32>} : memref<2x16xf32, #tpu.memory_space<vmem>>, vector<2x16xf32>,
    %c0_41 = arith.constant 0 : index
    %c0_42 = arith.constant 0 : index
    %183 = vector.load %arg1[%c0_41, %c0_42] : memref<2x8xf32, #tpu.memory_space<vmem>>, vector<2x8xf32>
    %cst_43 = arith.constant 5.000000e+00 : f32
    %184 = vector.broadcast %cst_43 : f32 to vector<2x8xf32>
    %185 = arith.mulf %183, %184 : vector<2x8xf32>
    %cst_44 = arith.constant 0.000000e+00 : f32
    %186 = vector.broadcast %cst_44 : f32 to vector<2x8xf32>
    %187 = arith.addf %185, %186 : vector<2x8xf32>
    %c0_45 = arith.constant 0 : index
    %c0_46 = arith.constant 0 : index
    %188 = vector.load %arg6[%c0_45, %c0_46] : memref<2x24xf32, #tpu.memory_space<vmem>>, vector<2x8xf32>
    tpu.vector_store %arg6[%c0_45, %c0_46], %187 {strides = array<i32>} : memref<2x24xf32, #tpu.memory_space<vmem>>, vector<2x8xf32>,
    %189 = vector.extract_strided_slice %181 {offsets = [0, 8], sizes = [2, 8], strides = [1, 1]} : vector<2x16xf32> to vector<2x8xf32>
    %cst_47 = arith.constant 1.200000e+01 : f32
    %190 = vector.broadcast %cst_47 : f32 to vector<2x8xf32>
    %191 = arith.mulf %189, %190 : vector<2x8xf32>
    %cst_48 = arith.constant 0.000000e+00 : f32
    %192 = vector.broadcast %cst_48 : f32 to vector<2x8xf32>
    %193 = arith.addf %191, %192 : vector<2x8xf32>
    %c0_49 = arith.constant 0 : index
    %c8 = arith.constant 8 : index
    %194 = vector.load %arg6[%c0_49, %c8] : memref<2x24xf32, #tpu.memory_space<vmem>>, vector<2x8xf32>
    tpu.vector_store %arg6[%c0_49, %c8], %193 {strides = array<i32>} : memref<2x24xf32, #tpu.memory_space<vmem>>, vector<2x8xf32>,
    %195 = vector.extract_strided_slice %181 {offsets = [0, 0], sizes = [2, 8], strides = [1, 1]} : vector<2x16xf32> to vector<2x8xf32>
    %cst_50 = arith.constant 8.000000e+01 : f32
    %196 = vector.broadcast %cst_50 : f32 to vector<2x8xf32>
    %197 = arith.mulf %195, %196 : vector<2x8xf32>
    %cst_51 = arith.constant 1.000000e+01 : f32
    %198 = vector.broadcast %cst_51 : f32 to vector<2x8xf32>
    %199 = arith.addf %197, %198 : vector<2x8xf32>
    %c0_52 = arith.constant 0 : index
    %c16 = arith.constant 16 : index
    %200 = vector.load %arg6[%c0_52, %c16] : memref<2x24xf32, #tpu.memory_space<vmem>>, vector<2x8xf32>
    tpu.vector_store %arg6[%c0_52, %c16], %199 {strides = array<i32>} : memref<2x24xf32, #tpu.memory_space<vmem>>, vector<2x8xf32>,
    return
  }
}

</mosaic_0001>

<bundles_post_ra>
// kernel: tpu_custom_call.1
= control target key start
LH: loop header
LB: loop body
LE: loop exit
PB: predicated region body
PF: predicated region fallthrough
CT: control target
= control target key end

     0   :  { %12 = vsyncpa [#allocation3], 0  ;;  %v1330_v3 = vmov 0.0|0.0   ;;  %vm1331_vm0 = vmmov 0   ;;  %v1332_v6 = vmov 0.0   ;;  %s1569_s0 = inlined_call_operand.vmem [shape: f32[8,2,128], index: 0, kind: input, shape index: {}]   ;;  %s1570_s1 = inlined_call_operand.vmem [shape: f32[2,8], index: 1, kind: input, shape index: {}]   ;;  %s1571_s2 = inlined_call_operand.vmem [shape: f32[32,128], index: 2, kind: input, shape index: {}]   ;;  %s1572_s3 = inlined_call_operand.vmem [shape: f32[32,16], index: 3, kind: input, shape index: {}]   ;;  %s1573_s4 = inlined_call_operand.vmem [shape: f32[1,16], index: 4, kind: input, shape index: {}]   ;;  %s1574_s5 = inlined_call_operand.hbm [shape: f32[2,16], index: 5, kind: output, shape index: {0}]   ;;  %s1575_s6 = inlined_call_operand.hbm [shape: f32[2,24], index: 6, kind: output, shape index: {1}]  }
   0x1   :  { %v24_v0 = vld [vmem:[%s1571_s2] sm:$0xff]  ;;  %v25_v1 = vld [vmem:[%s1571_s2 + $0x8] sm:$0xff]  ;;  %v26_v2 = vld [vmem:[%s1571_s2 + $0x10] sm:$0xff]  ;;  %1156 = vmatprep.subr.bf16.mxu0 %v1330_v3  ;;  %1065 = vmatprep.mubr.msk.f32.mxu0 %vm1331_vm0, %v1332_v6 }
   0x2   :  { %v1383_v4 = vpack.c.bf16 %v25_v1, %v24_v0  ;;  %v27_v5 = vld [vmem:[%s1571_s2 + $0x18] sm:$0xff] }
   0x3   :  { %13 = vsyncpa [#allocation5], 0  ;;  %1162 = vmatprep.subr.bf16.mxu1 %v1330_v3  ;;  %1076 = vmatprep.mubr.msk.f32.mxu1 %vm1331_vm0, %v1332_v6  ;;  %v1394_v7 = vpack.c.bf16 %v27_v5, %v26_v2  ;;  %v33_v8 = vld [vmem:[%s1569_s0] sm:$0x3]  ;;  %v28_v14 = vlaneseq  ;;  %s1333_s30 = smov 64   ;;  %s1334_s7 = smov 32  }
   0x4   :  { %1158 = vmatpush3.bf16.msra.mxu0 %v1383_v4  ;;  %1164 = vmatpush3.bf16.msra.mxu1 %v1383_v4  ;;  %vm34_vm4 = vcmask 261120   ;;  %v989_v30 = vld [vmem:[%s1569_s0 + $0x2] sm:$0x3]  ;;  %v992_v49 = vld [vmem:[%s1569_s0 + $0x4] sm:$0x3]  ;;  %v857_v17 = vld [vmem:[%s1572_s3 + $0x10] sm:$0xff] }
   0x5   :  { %1159 = vmatprep.subr.bf16.mxu0 %v1330_v3  ;;  %1165 = vmatprep.subr.bf16.mxu1 %v1330_v3  ;;  %v29_v16 = vand.u32 127, %v28_v14  ;;  %vm946_vm5 = vcmask 58368   ;;  %s1335_s9 = smov [#allocation2]   ;;  %vm941_vm6 = vcmask 123904   ;;  %vm950_vm7 = vcmask 123968  }
   0x7   :  { %vm30_vm1 = vcmp.ge.s32.totalorder %v29_v16, 64  ;;  %vm31_vm2 = vcmp.lt.s32.totalorder %v29_v16, 96 }
   0x8   :  { %1161 = vmatpush3.bf16.msra.mxu0 %v1394_v7  ;;  %1167 = vmatpush3.bf16.msra.mxu1 %v1394_v7  ;;  %vm1413_vm3 = vmand %vm30_vm1, %vm31_vm2 }
   0x9   :  { %1168 = vmatprep.subr.bf16.mxu0 %v1330_v3  ;;  %1174 = vmatprep.subr.bf16.mxu1 %v1330_v3 }
   0xb   :  { %1066 = vmatmul.mubr.f32.vlgmr.msra.gmra.mrb[0].mxu0 %v1332_v6 }
   0xc   :  { %1170 = vmatpush3.bf16.msra.mxu0 %v1383_v4  ;;  %1087 = vmatprep.mubr.msk.f32.mxu0 %vm1331_vm0, %v1332_v6 }
   0xd   :  { %1171 = vmatprep.subr.bf16.mxu0 %v1330_v3 }
  0x10   :  { %1173 = vmatpush3.bf16.msra.mxu0 %v1394_v7 }
  0x11   :  { %1180 = vmatprep.subr.bf16.mxu0 %v1330_v3 }
  0xde   :  { %v104_v9 = vpop.f32.mrb[0].mxu0 }
  0xdf   :  { %v108_v10 = vadd.f32 %v104_v9, %v33_v8  ;;  %v1067_v11 = vpop.f32.mrb[1].mxu0  ;;  %v995_v8 = vld [vmem:[%s1569_s0 + $0x6] sm:$0x3] }
  0xe1   :  { %v988_v12 = vmul.f32 -1.442695, %v108_v10 }
  0xe3   :  { %1218 = vpow2.f32 %v988_v12 }
  0xe4   :  { %1220 = vtanh.f32 %v108_v10 }
  0xed   :  { %v1219_v13 = vpop.eup %1218 }
  0xee   :  { %v113_v15 = vadd.f32 1.0, %v1219_v13  ;;  %v1221_v18 = vpop.eup %1220 }
  0xf0   :  { %1222 = vrcp.f32 %v113_v15 }
  0xfa   :  { %v1223_v19 = vpop.eup %1222 }
  0xfb   :  { %v116_v20 = vsel %vm1413_vm3, %v1221_v18, %v1223_v19 }
  0xfc   :  { %119 = vrot.lane.b32.xlu0 %v116_v20, %s1333_s30  ;;  %v117_v23 = vmul.f32 0.0, %v116_v20 }
 0x16e   :  { %v120_v21 = vpop.permute.xlu0 %119 }
 0x16f   :  { %v122_v22 = vmul.f32 %v120_v21, %v116_v20 }
 0x171   :  { %124 = vrot.lane.b32.xlu0 %v122_v22, %s1334_s7 }
 0x1e3   :  { %v125_v24 = vpop.permute.xlu0 %124 }
 0x1e4   :  { %v127_v25 = vadd.f32 %v125_v24, %v117_v23 }
 0x1e6   :  { %1224 = vtanh.f32 %v127_v25 }
 0x1f0   :  { %v1225_v26 = vpop.eup %1224 }
 0x1f1   :  { %130 = vrot.lane.b32.xlu1 %v1225_v26, %s1333_s30 }
 0x263   :  { %v131_v27 = vpop.permute.xlu1 %130 }
 0x264   :  { %v133_v28 = vmul.f32 %v131_v27, %v116_v20 }
 0x266   :  { %137 = vrot.lane.b32.xlu1 %v133_v28, %s1334_s7  ;;  %v998_v28 = vld [vmem:[%s1569_s0 + $0x8] sm:$0x3] }
 0x2d8   :  { %v138_v29 = vpop.permute.xlu1 %137 }
 0x2d9   :  { %1077 = vmatmul.mubr.msk.f32.vlgmr.msra.gmra.mrb[0].mxu1 %vm34_vm4, %v138_v29 }
 0x2da   :  { %1176 = vmatpush3.bf16.msra.mxu1 %v1383_v4  ;;  %1098 = vmatprep.mubr.msk.f32.mxu1 %vm1331_vm0, %v1332_v6 }
 0x2db   :  { %1177 = vmatprep.subr.bf16.mxu1 %v1330_v3 }
 0x2de   :  { %1179 = vmatpush3.bf16.msra.mxu1 %v1394_v7 }
 0x2df   :  { %1186 = vmatprep.subr.bf16.mxu1 %v1330_v3 }
 0x3ac   :  { %v207_v31 = vpop.f32.mrb[0].mxu1 }
 0x3ad   :  { %v211_v32 = vadd.f32 %v989_v30, %v207_v31  ;;  %v1078_v33 = vpop.f32.mrb[1].mxu1 }
 0x3af   :  { %v991_v34 = vmul.f32 -1.442695, %v211_v32 }
 0x3b1   :  { %1226 = vpow2.f32 %v991_v34 }
 0x3b2   :  { %1228 = vtanh.f32 %v211_v32 }
 0x3bb   :  { %v1227_v35 = vpop.eup %1226 }
 0x3bc   :  { %v216_v36 = vadd.f32 1.0, %v1227_v35  ;;  %v1229_v37 = vpop.eup %1228 }
 0x3be   :  { %1230 = vrcp.f32 %v216_v36 }
 0x3c8   :  { %v1231_v38 = vpop.eup %1230 }
 0x3c9   :  { %v219_v39 = vsel %vm1413_vm3, %v1229_v37, %v1231_v38 }
 0x3ca   :  { %222 = vrot.lane.b32.xlu0 %v219_v39, %s1333_s30  ;;  %v220_v42 = vmul.f32 %v219_v39, %v127_v25 }
 0x43c   :  { %v223_v40 = vpop.permute.xlu0 %222 }
 0x43d   :  { %v225_v41 = vmul.f32 %v223_v40, %v219_v39 }
 0x43f   :  { %227 = vrot.lane.b32.xlu1 %v225_v41, %s1334_s7 }
 0x4b1   :  { %v228_v43 = vpop.permute.xlu1 %227 }
 0x4b2   :  { %v230_v44 = vadd.f32 %v228_v43, %v220_v42 }
 0x4b4   :  { %1232 = vtanh.f32 %v230_v44 }
 0x4be   :  { %v1233_v45 = vpop.eup %1232 }
 0x4bf   :  { %233 = vrot.lane.b32.xlu0 %v1233_v45, %s1333_s30 }
 0x531   :  { %v234_v46 = vpop.permute.xlu0 %233 }
 0x532   :  { %v236_v47 = vmul.f32 %v234_v46, %v219_v39 }
 0x534   :  { %240 = vrot.lane.b32.xlu1 %v236_v47, %s1334_s7  ;;  %v1001_v47 = vld [vmem:[%s1569_s0 + $0xa] sm:$0x3] }
 0x5a6   :  { %v241_v48 = vpop.permute.xlu1 %240 }
 0x5a7   :  { %1088 = vmatmul.mubr.msk.f32.vlgmr.msra.gmra.mrb[2].mxu0 %vm34_vm4, %v241_v48 }
 0x5a8   :  { %1182 = vmatpush3.bf16.msra.mxu0 %v1383_v4  ;;  %1109 = vmatprep.mubr.msk.f32.mxu0 %vm1331_vm0, %v1332_v6 }
 0x5a9   :  { %1183 = vmatprep.subr.bf16.mxu0 %v1330_v3 }
 0x5ac   :  { %1185 = vmatpush3.bf16.msra.mxu0 %v1394_v7 }
 0x5ad   :  { %1192 = vmatprep.subr.bf16.mxu0 %v1330_v3 }
 0x67a   :  { %v310_v50 = vpop.f32.mrb[2].mxu0 }
 0x67b   :  { %v314_v51 = vadd.f32 %v992_v49, %v310_v50  ;;  %v1089_v52 = vpop.f32.mrb[3].mxu0 }
 0x67d   :  { %v994_v53 = vmul.f32 -1.442695, %v314_v51 }
 0x67f   :  { %1234 = vpow2.f32 %v994_v53 }
 0x680   :  { %1236 = vtanh.f32 %v314_v51 }
 0x689   :  { %v1235_v54 = vpop.eup %1234 }
 0x68a   :  { %v319_v55 = vadd.f32 1.0, %v1235_v54  ;;  %v1237_v56 = vpop.eup %1236 }
 0x68c   :  { %1238 = vrcp.f32 %v319_v55 }
 0x696   :  { %v1239_v57 = vpop.eup %1238 }
 0x697   :  { %v322_v58 = vsel %vm1413_vm3, %v1237_v56, %v1239_v57 }
 0x698   :  { %325 = vrot.lane.b32.xlu0 %v322_v58, %s1333_s30  ;;  %v323_v61 = vmul.f32 %v322_v58, %v230_v44 }
 0x70a   :  { %v326_v59 = vpop.permute.xlu0 %325 }
 0x70b   :  { %v328_v60 = vmul.f32 %v326_v59, %v322_v58 }
 0x70d   :  { %330 = vrot.lane.b32.xlu1 %v328_v60, %s1334_s7 }
 0x77f   :  { %v331_v62 = vpop.permute.xlu1 %330 }
 0x780   :  { %v333_v63 = vadd.f32 %v331_v62, %v323_v61 }
 0x782   :  { %1240 = vtanh.f32 %v333_v63 }
 0x78c   :  { %v1241_v0 = vpop.eup %1240 }
 0x78d   :  { %336 = vrot.lane.b32.xlu0 %v1241_v0, %s1333_s30  ;;  %v1004_v0 = vld [vmem:[%s1569_s0 + $0xc] sm:$0x3] }
 0x7ff   :  { %v337_v1 = vpop.permute.xlu0 %336 }
 0x800   :  { %v339_v2 = vmul.f32 %v337_v1, %v322_v58 }
 0x802   :  { %343 = vrot.lane.b32.xlu1 %v339_v2, %s1334_s7 }
 0x874   :  { %v344_v5 = vpop.permute.xlu1 %343 }
 0x875   :  { %1099 = vmatmul.mubr.msk.f32.vlgmr.msra.gmra.mrb[2].mxu1 %vm34_vm4, %v344_v5 }
 0x876   :  { %1188 = vmatpush3.bf16.msra.mxu1 %v1383_v4  ;;  %1120 = vmatprep.mubr.msk.f32.mxu1 %vm1331_vm0, %v1332_v6 }
 0x877   :  { %1189 = vmatprep.subr.bf16.mxu1 %v1330_v3 }
 0x87a   :  { %1191 = vmatpush3.bf16.msra.mxu1 %v1394_v7 }
 0x87b   :  { %1198 = vmatprep.subr.bf16.mxu1 %v1330_v3 }
 0x948   :  { %v413_v9 = vpop.f32.mrb[2].mxu1 }
 0x949   :  { %v417_v10 = vadd.f32 %v995_v8, %v413_v9  ;;  %v1100_v11 = vpop.f32.mrb[3].mxu1 }
 0x94b   :  { %v997_v12 = vmul.f32 -1.442695, %v417_v10 }
 0x94d   :  { %1242 = vpow2.f32 %v997_v12 }
 0x94e   :  { %1244 = vtanh.f32 %v417_v10 }
 0x957   :  { %v1243_v13 = vpop.eup %1242 }
 0x958   :  { %v422_v14 = vadd.f32 1.0, %v1243_v13  ;;  %v1245_v15 = vpop.eup %1244 }
 0x95a   :  { %1246 = vrcp.f32 %v422_v14 }
 0x964   :  { %v1247_v16 = vpop.eup %1246 }
 0x965   :  { %v425_v18 = vsel %vm1413_vm3, %v1245_v15, %v1247_v16 }
 0x966   :  { %428 = vrot.lane.b32.xlu0 %v425_v18, %s1333_s30  ;;  %v426_v21 = vmul.f32 %v425_v18, %v333_v63 }
 0x9d8   :  { %v429_v19 = vpop.permute.xlu0 %428 }
 0x9d9   :  { %v431_v20 = vmul.f32 %v429_v19, %v425_v18 }
 0x9db   :  { %433 = vrot.lane.b32.xlu1 %v431_v20, %s1334_s7 }
 0xa4d   :  { %v434_v22 = vpop.permute.xlu1 %433 }
 0xa4e   :  { %v436_v23 = vadd.f32 %v434_v22, %v426_v21 }
 0xa50   :  { %1248 = vtanh.f32 %v436_v23 }
 0xa5a   :  { %v1249_v24 = vpop.eup %1248 }
 0xa5b   :  { %439 = vrot.lane.b32.xlu0 %v1249_v24, %s1333_s30 }
 0xacd   :  { %v440_v25 = vpop.permute.xlu0 %439 }
 0xace   :  { %v442_v26 = vmul.f32 %v440_v25, %v425_v18 }
 0xad0   :  { %446 = vrot.lane.b32.xlu1 %v442_v26, %s1334_s7 }
 0xb42   :  { %v447_v27 = vpop.permute.xlu1 %446 }
 0xb43   :  { %1110 = vmatmul.mubr.msk.f32.vlgmr.msra.gmra.mrb[4].mxu0 %vm34_vm4, %v447_v27 }
 0xb44   :  { %1194 = vmatpush3.bf16.msra.mxu0 %v1383_v4  ;;  %1131 = vmatprep.mubr.msk.f32.mxu0 %vm1331_vm0, %v1332_v6 }
 0xb45   :  { %1195 = vmatprep.subr.bf16.mxu0 %v1330_v3 }
 0xb48   :  { %1197 = vmatpush3.bf16.msra.mxu0 %v1394_v7 }
 0xb49   :  { %1204 = vmatprep.subr.bf16.mxu0 %v1330_v3 }
 0xc16   :  { %v516_v29 = vpop.f32.mrb[4].mxu0 }
 0xc17   :  { %v520_v30 = vadd.f32 %v998_v28, %v516_v29  ;;  %v1111_v31 = vpop.f32.mrb[5].mxu0 }
 0xc19   :  { %v1000_v32 = vmul.f32 -1.442695, %v520_v30 }
 0xc1b   :  { %1250 = vpow2.f32 %v1000_v32 }
 0xc1c   :  { %1252 = vtanh.f32 %v520_v30 }
 0xc25   :  { %v1251_v33 = vpop.eup %1250 }
 0xc26   :  { %v525_v34 = vadd.f32 1.0, %v1251_v33  ;;  %v1253_v35 = vpop.eup %1252 }
 0xc28   :  { %1254 = vrcp.f32 %v525_v34 }
 0xc32   :  { %v1255_v36 = vpop.eup %1254 }
 0xc33   :  { %v528_v37 = vsel %vm1413_vm3, %v1253_v35, %v1255_v36 }
 0xc34   :  { %531 = vrot.lane.b32.xlu0 %v528_v37, %s1333_s30  ;;  %v529_v40 = vmul.f32 %v528_v37, %v436_v23  ;;  %v1007_v23 = vld [vmem:[%s1569_s0 + $0xe] sm:$0x3] }
 0xca6   :  { %v532_v38 = vpop.permute.xlu0 %531 }
 0xca7   :  { %v534_v39 = vmul.f32 %v532_v38, %v528_v37  ;;  %v855_v38 = vld [vmem:[%s1572_s3] sm:$0xff] }
 0xca9   :  { %536 = vrot.lane.b32.xlu1 %v534_v39, %s1334_s7  ;;  %v856_v39 = vld [vmem:[%s1572_s3 + $0x8] sm:$0xff] }
 0xd1b   :  { %v537_v41 = vpop.permute.xlu1 %536 }
 0xd1c   :  { %v539_v42 = vadd.f32 %v537_v41, %v529_v40  ;;  %v1205_v40 = vpack.c.bf16 %v856_v39, %v855_v38  ;;  %v858_v41 = vld [vmem:[%s1572_s3 + $0x18] sm:$0xff] }
 0xd1e   :  { %1256 = vtanh.f32 %v539_v42 }
 0xd28   :  { %v1257_v43 = vpop.eup %1256 }
 0xd29   :  { %542 = vrot.lane.b32.xlu0 %v1257_v43, %s1333_s30 }
 0xd9b   :  { %v543_v44 = vpop.permute.xlu0 %542 }
 0xd9c   :  { %v545_v45 = vmul.f32 %v543_v44, %v528_v37 }
 0xd9e   :  { %549 = vrot.lane.b32.xlu1 %v545_v45, %s1334_s7 }
 0xe10   :  { %v550_v46 = vpop.permute.xlu1 %549 }
 0xe11   :  { %1121 = vmatmul.mubr.msk.f32.vlgmr.msra.gmra.mrb[4].mxu1 %vm34_vm4, %v550_v46 }
 0xe12   :  { %1200 = vmatpush3.bf16.msra.mxu1 %v1383_v4  ;;  %1142 = vmatprep.mubr.msk.f32.mxu1 %vm1331_vm0, %v1332_v6 }
 0xe13   :  { %1201 = vmatprep.subr.bf16.mxu1 %v1330_v3 }
 0xe16   :  { %1203 = vmatpush3.bf16.msra.mxu1 %v1394_v7 }
 0xee4   :  { %v619_v48 = vpop.f32.mrb[4].mxu1 }
 0xee5   :  { %v623_v49 = vadd.f32 %v1001_v47, %v619_v48  ;;  %v1122_v50 = vpop.f32.mrb[5].mxu1  ;;  %v943_v47 = vld [vmem:[%s1570_s1] sm:$0x3] }
 0xee6   :  { %v944_v48 = vmul.f32 5.0, %v943_v47 }
 0xee7   :  { %v1003_v51 = vmul.f32 -1.442695, %v623_v49 }
 0xee8   :  { %947 = vst.msk [vmem:[#allocation4] sm:$0x3] %vm946_vm5, %v944_v48 }
 0xee9   :  { %1258 = vpow2.f32 %v1003_v51 }
 0xeea   :  { %1260 = vtanh.f32 %v623_v49 }
 0xef3   :  { %v1259_v52 = vpop.eup %1258 }
 0xef4   :  { %v628_v53 = vadd.f32 1.0, %v1259_v52  ;;  %v1261_v4 = vpop.eup %1260 }
 0xef6   :  { %1262 = vrcp.f32 %v628_v53 }
 0xf00   :  { %v1263_v54 = vpop.eup %1262 }
 0xf01   :  { %v631_v55 = vsel %vm1413_vm3, %v1261_v4, %v1263_v54 }
 0xf02   :  { %634 = vrot.lane.b32.xlu0 %v631_v55, %s1333_s30  ;;  %v632_v57 = vmul.f32 %v631_v55, %v539_v42  ;;  %v1208_v42 = vpack.c.bf16 %v858_v41, %v857_v17 }
 0xf74   :  { %v635_v7 = vpop.permute.xlu0 %634 }
 0xf75   :  { %v637_v56 = vmul.f32 %v635_v7, %v631_v55 }
 0xf77   :  { %639 = vrot.lane.b32.xlu1 %v637_v56, %s1334_s7 }
 0xfe9   :  { %v640_v58 = vpop.permute.xlu1 %639 }
 0xfea   :  { %v642_v59 = vadd.f32 %v640_v58, %v632_v57 }
 0xfec   :  { %1264 = vtanh.f32 %v642_v59 }
 0xff6   :  { %v1265_v60 = vpop.eup %1264 }
 0xff7   :  { %645 = vrot.lane.b32.xlu0 %v1265_v60, %s1333_s30 }
0x1069   :  { %v646_v61 = vpop.permute.xlu0 %645 }
0x106a   :  { %v648_v62 = vmul.f32 %v646_v61, %v631_v55 }
0x106c   :  { %652 = vrot.lane.b32.xlu1 %v648_v62, %s1334_s7 }
0x10de   :  { %v653_v63 = vpop.permute.xlu1 %652 }
0x10df   :  { %1132 = vmatmul.mubr.msk.f32.vlgmr.msra.gmra.mrb[6].mxu0 %vm34_vm4, %v653_v63 }
0x10e0   :  { %1153 = vmatprep.mubr.msk.f32.mxu0 %vm1331_vm0, %v1332_v6  ;;  %1206 = vmatpush3.bf16.msra.mxu0 %v1205_v40 }
0x10e1   :  { %1207 = vmatprep.subr.bf16.mxu0 %v1330_v3  ;;  %v1010_v3 = vld [vmem:[%s1573_s4] ss:$0 sm:$0xff] }
0x10e4   :  { %1209 = vmatpush3.bf16.msra.mxu0 %v1208_v42 }
0x11b2   :  { %v722_v1 = vpop.f32.mrb[6].mxu0 }
0x11b3   :  { %v726_v2 = vadd.f32 %v1004_v0, %v722_v1  ;;  %v1133_v5 = vpop.f32.mrb[7].mxu0 }
0x11b5   :  { %v1006_v8 = vmul.f32 -1.442695, %v726_v2 }
0x11b7   :  { %1266 = vpow2.f32 %v1006_v8 }
0x11b8   :  { %1268 = vtanh.f32 %v726_v2 }
0x11c1   :  { %v1267_v9 = vpop.eup %1266 }
0x11c2   :  { %v731_v10 = vadd.f32 1.0, %v1267_v9  ;;  %v1269_v11 = vpop.eup %1268 }
0x11c4   :  { %1270 = vrcp.f32 %v731_v10 }
0x11ce   :  { %v1271_v12 = vpop.eup %1270 }
0x11cf   :  { %v734_v13 = vsel %vm1413_vm3, %v1269_v11, %v1271_v12 }
0x11d0   :  { %737 = vrot.lane.b32.xlu0 %v734_v13, %s1333_s30  ;;  %v735_v15 = vmul.f32 %v734_v13, %v642_v59 }
0x1242   :  { %v738_v6 = vpop.permute.xlu0 %737 }
0x1243   :  { %v740_v14 = vmul.f32 %v738_v6, %v734_v13 }
0x1245   :  { %742 = vrot.lane.b32.xlu1 %v740_v14, %s1334_s7 }
0x12b7   :  { %v743_v16 = vpop.permute.xlu1 %742 }
0x12b8   :  { %v745_v18 = vadd.f32 %v743_v16, %v735_v15 }
0x12ba   :  { %1272 = vtanh.f32 %v745_v18 }
0x12c4   :  { %v1273_v19 = vpop.eup %1272 }
0x12c5   :  { %748 = vrot.lane.b32.xlu0 %v1273_v19, %s1333_s30 }
0x1337   :  { %v749_v20 = vpop.permute.xlu0 %748 }
0x1338   :  { %v751_v21 = vmul.f32 %v749_v20, %v734_v13 }
0x133a   :  { %755 = vrot.lane.b32.xlu1 %v751_v21, %s1334_s7 }
0x13ac   :  { %v756_v22 = vpop.permute.xlu1 %755 }
0x13ad   :  { %1143 = vmatmul.mubr.msk.f32.vlgmr.msra.gmra.mrb[6].mxu1 %vm34_vm4, %v756_v22 }
0x1480   :  { %v825_v24 = vpop.f32.mrb[6].mxu1 }
0x1481   :  { %v829_v25 = vadd.f32 %v1007_v23, %v825_v24  ;;  %v1144_v26 = vpop.f32.mrb[7].mxu1 }
0x1483   :  { %v1009_v27 = vmul.f32 -1.442695, %v829_v25 }
0x1485   :  { %1274 = vpow2.f32 %v1009_v27 }
0x1486   :  { %1276 = vtanh.f32 %v829_v25 }
0x148f   :  { %v1275_v28 = vpop.eup %1274 }
0x1490   :  { %v834_v29 = vadd.f32 1.0, %v1275_v28  ;;  %v1277_v30 = vpop.eup %1276 }
0x1492   :  { %1278 = vrcp.f32 %v834_v29 }
0x149c   :  { %v1279_v31 = vpop.eup %1278 }
0x149d   :  { %v837_v32 = vsel %vm1413_vm3, %v1277_v30, %v1279_v31 }
0x149e   :  { %840 = vrot.lane.b32.xlu0 %v837_v32, %s1333_s30  ;;  %v838_v35 = vmul.f32 %v837_v32, %v745_v18 }
0x1510   :  { %v841_v33 = vpop.permute.xlu0 %840 }
0x1511   :  { %v843_v34 = vmul.f32 %v841_v33, %v837_v32 }
0x1513   :  { %845 = vrot.lane.b32.xlu1 %v843_v34, %s1334_s7 }
0x1585   :  { %v846_v36 = vpop.permute.xlu1 %845 }
0x1586   :  { %v848_v37 = vadd.f32 %v846_v36, %v838_v35 }
0x1588   :  { %1280 = vtanh.f32 %v848_v37 }
0x1592   :  { %v1281_v43 = vpop.eup %1280 }
0x1593   :  { %851 = vrot.lane.b32.xlu0 %v1281_v43, %s1333_s30  ;;  %s966_s30 = sshll.u32 %s1335_s9, 4  ;;  %s967_s30 = int_to_ptr.vmem [resolvable:$true] %s966_s30 }
0x1594   :  { %p1287_p1 = scmp.lt.s32.totalorder %s967_s30, %s967_s30 }
0x1605   :  { %v852_v44 = vpop.permute.xlu0 %851 }
0x1606   :  { %v854_v45 = vmul.f32 %v852_v44, %v837_v32 }
0x1608   :  { %867 = vrot.lane.b32.xlu1 %v854_v45, %s1334_s7  ;;  %s1282_s7 = scalar_lea.vmem %s967_s30, 32 }
0x1609   :  { %p1283_p0 = scmp.ne.s32.totalorder %s967_s30, %s1282_s7  ;;  %p1288_p2 = scmp.lt.s32.totalorder %s1282_s7, %s1282_s7 }
0x160b   :  { %p1289_p3 = por %p1288_p2, %p1287_p1 }
0x160d   :  { %p1290_p4 = pnand %p1289_p3, %p1283_p0 }
0x167a   :  { %v868_v46 = vpop.permute.xlu1 %867 }
0x167b   :  { %1154 = vmatmul.mubr.msk.f32.vlgmr.msra.gmra.mrb[8].mxu0 %vm34_vm4, %v868_v46 }
0x174e   :  { %v937_v49 = vpop.f32.mrb[8].mxu0 }
0x174f   :  { %v938_v50 = vadd.f32 %v1010_v3, %v937_v49  ;;  %v1155_v51 = vpop.f32.mrb[9].mxu0 }
0x1751   :  { %v948_v52 = vmul.f32 12.0, %v938_v50  ;;  %v952_v53 = vmul.f32 80.0, %v938_v50  ;;  %942 = vst.msk [vmem:[#allocation2] sm:$0x3] %vm941_vm6, %v938_v50 }
0x1752   :  { %1293 = shalt.err (!%p1290_p4)
}
0x1753   :  { %s1294_s10 = scalar_lea.hbm %s1574_s5, 32 }
0x1754   :  { %p1295_p5 = scmp.ne.s32.totalorder %s1574_s5, %s1294_s10  ;;  %p1298_p6 = scmp.lt.u32.totalorder %s1294_s10, %s1574_s5 }
0x1756   :  { %p1300_p7 = pnand %p1298_p6, %p1295_p5 }
0x1758   :  { %1303 = shalt.err (!%p1300_p7)
}
0x1759   :  { %969 = dma.vmem_to_hbm [thread:$0]  %s967_s30, 32, %s1574_s5, [#allocation3]   ;;  %v953_v4 = vadd.f32 10.0, %v952_v53  ;;  %951 = vst.msk [vmem:[#allocation4] sm:$0x3] %vm950_vm7, %v948_v52  ;;  %vm958_vm8 = vcmask 189568  }
0x175a   :  { %s1336_s17 = smov 16   ;;  %s1337_s18 = smov [#allocation4]  }
0x175b   :  { %955 = vrot.lane.b32.xlu0 %v953_v4, %s1336_s17  ;;  %s976_s19 = sshll.u32 %s1337_s18, 4  ;;  %s977_s19 = int_to_ptr.vmem [resolvable:$true] %s976_s19 }
0x175c   :  { %s1304_s20 = scalar_lea.vmem %s977_s19, 32  ;;  %p1309_p9 = scmp.lt.s32.totalorder %s977_s19, %s977_s19 }
0x175d   :  { %p1305_p8 = scmp.ne.s32.totalorder %s977_s19, %s1304_s20  ;;  %p1310_p10 = scmp.lt.s32.totalorder %s1304_s20, %s1304_s20 }
0x175f   :  { %p1311_p11 = por %p1310_p10, %p1309_p9 }
0x1761   :  { %p1312_p12 = pnand %p1311_p11, %p1305_p8 }
0x17cd   :  { %v956_v54 = vpop.permute.xlu0 %955 }
0x17ce   :  { %959 = vst.msk [vmem:[#allocation4] sm:$0x3] %vm958_vm8, %v956_v54 }
0x17cf   :  { %1315 = shalt.err (!%p1312_p12)
}
0x17d0   :  { %s1316_s0 = scalar_lea.hbm %s1575_s6, 32 }
0x17d1   :  { %p1317_p13 = scmp.ne.s32.totalorder %s1575_s6, %s1316_s0  ;;  %p1320_p0 = scmp.lt.u32.totalorder %s1316_s0, %s1575_s6 }
0x17d3   :  { %p1322_p1 = pnand %p1320_p0, %p1317_p13 }
0x17d5   :  { %1325 = shalt.err (!%p1322_p1)
}
0x17d6   :  { %979 = dma.vmem_to_hbm [thread:$0]  %s977_s19, 32, %s1575_s6, [#allocation5]  }
0x17d7   :  { %1326 = dma.done.wait [#allocation3], 32  }
0x17d8   :  { %1327 = vsyncadd [#allocation3], 4294967264 }
0x17d9   :  { %1328 = dma.done.wait [#allocation5], 32  }
0x17da   :  { %1329 = vsyncadd [#allocation5], 4294967264 }
0x17db   :  { %986 = vsyncpa [#allocation3], 1 }
0x17dc   :  { %987 = vsyncpa [#allocation5], 1 }

</bundles_post_ra>
